<compile_context>
chip_gen: v6e
topology: v6e:2x2x1
jax: 0.10.0
libtpu: 0.0.40
codegen_flags: <defaults>
</compile_context>

<pallas_src>
import functools
import math

import jax
import jax.numpy as jnp
from jax.experimental import pallas as pl
from jax.experimental.pallas import tpu as pltpu


# ----------------------------------------------------------------------------
# VMEM budget / tiling helpers
# ----------------------------------------------------------------------------
def _default_vmem_limit():
    # ~75% of physical VMEM: ~48 MiB on v7x (64 MiB), ~96 MiB on v5e/v6e (128 MiB).
    try:
        cap = pltpu.get_tpu_info().vmem_capacity_bytes
        return int(cap * 3 // 4)
    except Exception:
        return 48 * 1024 * 1024          # safe fallback (fits every generation)


VMEM_LIMIT = _default_vmem_limit()

# Default tile targets (multiples of 128 -> good on the v5e 128x128 MXU too;
# sized so double-buffered tiles fit comfortably inside v7x's 64 MiB VMEM).
TM_DEFAULT = 256
TN_DEFAULT = 512
TK_DEFAULT = 512


def _pick_tile(dim, preferred):
    """Largest exact divisor of `dim` that is <= preferred (full dim if small)."""
    if dim <= preferred:
        return dim
    for t in range(preferred, 0, -1):
        if dim % t == 0:
            return t
    return dim


def _layer_norm(y, gamma, beta, eps):
    mean = jnp.mean(y, axis=-1, keepdims=True)
    var = jnp.mean(jnp.square(y - mean), axis=-1, keepdims=True)
    y = (y - mean) * jax.lax.rsqrt(var + eps)       # rsqrt -> EUP slot
    return y * gamma + beta


def _gelu_exact(y):
    # exact (erf-based) GELU, matching HF BertIntermediate's default "gelu"
    return 0.5 * y * (1.0 + jax.lax.erf(y * jnp.float32(0.7071067811865476)))


# ----------------------------------------------------------------------------
# Pallas kernels
# ----------------------------------------------------------------------------
def _linear_kernel(x_ref, w_ref, b_ref, o_ref, acc_ref, *, n_k):
    """Tiled y = x @ w + b with K-axis reduction in a f32 VMEM accumulator."""
    k = pl.program_id(2)

    @pl.when(k == 0)
    def _init():
        acc_ref[...] = jnp.zeros_like(acc_ref)

    acc_ref[...] += jnp.dot(
        x_ref[...].astype(jnp.bfloat16), w_ref[...].astype(jnp.bfloat16),
        preferred_element_type=jnp.float32)

    @pl.when(k == n_k - 1)
    def _fin():
        y = acc_ref[...] + b_ref[...].astype(jnp.float32)
        o_ref[...] = y.astype(o_ref.dtype)


def _linear_add_ln_kernel(x_ref, w_ref, b_ref, res_ref, g_ref, beta_ref,
                          o_ref, acc_ref, *, eps, n_k):
    """Tiled y = LayerNorm(x @ w + b + residual): the LN is fused into the
    epilogue of the final K step (saves two full [M, H] HBM round trips)."""
    k = pl.program_id(1)

    @pl.when(k == 0)
    def _init():
        acc_ref[...] = jnp.zeros_like(acc_ref)

    acc_ref[...] += jnp.dot(
        x_ref[...].astype(jnp.bfloat16), w_ref[...].astype(jnp.bfloat16),
        preferred_element_type=jnp.float32)

    @pl.when(k == n_k - 1)
    def _fin():
        y = acc_ref[...] + b_ref[...].astype(jnp.float32) \
            + res_ref[...].astype(jnp.float32)
        y = _layer_norm(y, g_ref[...].astype(jnp.float32),
                        beta_ref[...].astype(jnp.float32), eps)
        o_ref[...] = y.astype(o_ref.dtype)


def _ffn_kernel(x_ref, wi_ref, bi_ref, wo_ref, bo_ref, g_ref, beta_ref,
                o_ref, acc_ref, *, eps, n_i):
    """Fused BERT FFN: per I-tile compute GELU(x@Wi+bi) in VMEM and immediately
    accumulate @Wo; the epilogue adds bo + residual(x) and applies LayerNorm.
    The [M, 4H] intermediate never goes to HBM."""
    t = pl.program_id(1)

    @pl.when(t == 0)
    def _init():
        acc_ref[...] = jnp.zeros_like(acc_ref)

    x = x_ref[...].astype(jnp.bfloat16)
    h = jnp.dot(x, wi_ref[...].astype(jnp.bfloat16),
                preferred_element_type=jnp.float32) \
        + bi_ref[...].astype(jnp.float32)
    h = _gelu_exact(h)                                      # f32 GELU
    acc_ref[...] += jnp.dot(h.astype(jnp.bfloat16),
                            wo_ref[...].astype(jnp.bfloat16),
                            preferred_element_type=jnp.float32)

    @pl.when(t == n_i - 1)
    def _fin():
        y = acc_ref[...] + bo_ref[...].astype(jnp.float32) \
            + x_ref[...].astype(jnp.float32)                # residual = x itself
        y = _layer_norm(y, g_ref[...].astype(jnp.float32),
                        beta_ref[...].astype(jnp.float32), eps)
        o_ref[...] = y.astype(o_ref.dtype)


def _mha_kernel(qkv_ref, o_ref, *, heads, dh, scale):
    """Multi-head self-attention for one batch element.  Blocks are lane-dense
    ([L, 3H] in, [L, H] out); the head split is done in-kernel with static
    lane slices, so there is no wrapper-side transpose / dh-last DMA."""
    qkv = qkv_ref[0].astype(jnp.float32)                    # [L, 3H]
    H = heads * dh
    ctx = []
    for h in range(heads):                                  # static unroll
        q = qkv[:, h * dh:(h + 1) * dh].astype(jnp.bfloat16)
        k = qkv[:, H + h * dh:H + (h + 1) * dh].astype(jnp.bfloat16)
        v = qkv[:, 2 * H + h * dh:2 * H + (h + 1) * dh].astype(jnp.bfloat16)
        # scores [L, L] = q @ k^T (contraction on dh, no explicit transpose)
        s = jax.lax.dot_general(q, k, (((1,), (1,)), ((), ())),
                                preferred_element_type=jnp.float32) * scale
        s = s - jnp.max(s, axis=-1, keepdims=True)
        p = jnp.exp(s)
        p = p * pl.reciprocal(jnp.sum(p, axis=-1, keepdims=True), approx=True)
        ctx.append(jnp.dot(p.astype(jnp.bfloat16), v,
                           preferred_element_type=jnp.float32))   # [L, dh]
    o_ref[0] = jnp.concatenate(ctx, axis=-1).astype(o_ref.dtype)  # [L, H]
    # TODO(synk): for long L, switch to a flash-style kv-tiled online softmax
    #             (m/l/acc scratch) so the [L, L] scores never fully materialize.


def _word_transform_kernel(x_ref, wt_w_ref, wt_b_ref, ww_w_ref, ww_b_ref, o_ref):
    """Fused word_transform(tanh) + word_word_weight: tanh intermediate stays
    in VMEM (no [N*L*W, H] HBM round trip between the two linears)."""
    t = jnp.dot(x_ref[...].astype(jnp.bfloat16), wt_w_ref[...].astype(jnp.bfloat16),
                preferred_element_type=jnp.float32) + wt_b_ref[...].astype(jnp.float32)
    t = jnp.tanh(t)                                         # EUP slot
    y = jnp.dot(t.astype(jnp.bfloat16), ww_w_ref[...].astype(jnp.bfloat16),
                preferred_element_type=jnp.float32) + ww_b_ref[...].astype(jnp.float32)
    o_ref[...] = y.astype(o_ref.dtype)


def _word_fuse_kernel(lo_ref, aw_ref, wo_ref, wm_ref, io_ref, im_ref,
                      g_ref, b_ref, o_ref, *, eps):
    """Lexicon fusion for one batch element: bilinear scoring via attn_W,
    masked softmax over W, weighted sums, fusion residual + fuse LayerNorm."""
    lo = lo_ref[0].astype(jnp.float32)                      # [L, H]
    proj = jnp.dot(lo.astype(jnp.bfloat16), aw_ref[...].astype(jnp.bfloat16),
                   preferred_element_type=jnp.float32)      # [L, H]  (lo @ attn_W)

    def weighted_sum(word_ref, mask_ref):
        wo = word_ref[0].astype(jnp.float32)                # [L, W, H]
        wm = mask_ref[0].astype(jnp.float32)                # [L, W]
        # H is the last (lane) dim of the multiply-reduce -> vreg-aligned reduce.
        scores = jnp.sum(proj[:, None, :] * wo, axis=-1)    # [L, W]
        scores = scores + (1.0 - wm) * (-10000.0)           # matches PyTorch masking
        scores = scores - jnp.max(scores, axis=-1, keepdims=True)
        p = jnp.exp(scores)
        p = p * pl.reciprocal(jnp.sum(p, axis=-1, keepdims=True), approx=True)
        return jnp.sum(wo * p[:, :, None], axis=1)          # [L, H]

    fused = lo + weighted_sum(wo_ref, wm_ref) + weighted_sum(io_ref, im_ref)
    y = _layer_norm(fused, g_ref[...].astype(jnp.float32),
                    b_ref[...].astype(jnp.float32), eps)
    o_ref[0] = y.astype(o_ref.dtype)


# ----------------------------------------------------------------------------
# Thin wrappers around pallas_call
# ----------------------------------------------------------------------------
def pallas_linear(x, w, b, tm=TM_DEFAULT, tn=TN_DEFAULT, tk=TK_DEFAULT):
    M, K = x.shape
    N = w.shape[1]
    tm, tn, tk = _pick_tile(M, tm), _pick_tile(N, tn), _pick_tile(K, tk)
    nk = K // tk
    return pl.pallas_call(
        functools.partial(_linear_kernel, n_k=nk),
        out_shape=jax.ShapeDtypeStruct((M, N), jnp.float32),
        grid=(M // tm, N // tn, nk),
        in_specs=[pl.BlockSpec((tm, tk), lambda i, j, k: (i, k)),
                  pl.BlockSpec((tk, tn), lambda i, j, k: (k, j)),
                  pl.BlockSpec((1, tn), lambda i, j, k: (0, j))],
        out_specs=pl.BlockSpec((tm, tn), lambda i, j, k: (i, j)),
        scratch_shapes=[pltpu.VMEM((tm, tn), jnp.float32)],
        compiler_params=pltpu.CompilerParams(
            dimension_semantics=("parallel", "parallel", "arbitrary"),
            vmem_limit_bytes=VMEM_LIMIT),
    )(x, w, b)


def pallas_linear_add_ln(x, w, b, res, gamma, beta, eps,
                         tm=TM_DEFAULT, tk=TK_DEFAULT):
    M, K = x.shape
    N = w.shape[1]                    # full output row per tile (needed for LN)
    tm, tk = _pick_tile(M, tm), _pick_tile(K, tk)
    nk = K // tk
    return pl.pallas_call(
        functools.partial(_linear_add_ln_kernel, eps=eps, n_k=nk),
        out_shape=jax.ShapeDtypeStruct((M, N), jnp.float32),
        grid=(M // tm, nk),
        in_specs=[pl.BlockSpec((tm, tk), lambda i, k: (i, k)),
                  pl.BlockSpec((tk, N), lambda i, k: (k, 0)),
                  pl.BlockSpec((1, N), lambda i, k: (0, 0)),
                  pl.BlockSpec((tm, N), lambda i, k: (i, 0)),
                  pl.BlockSpec((1, N), lambda i, k: (0, 0)),
                  pl.BlockSpec((1, N), lambda i, k: (0, 0))],
        out_specs=pl.BlockSpec((tm, N), lambda i, k: (i, 0)),
        scratch_shapes=[pltpu.VMEM((tm, N), jnp.float32)],
        compiler_params=pltpu.CompilerParams(
            dimension_semantics=("parallel", "arbitrary"),
            vmem_limit_bytes=VMEM_LIMIT),
    )(x, w, b, res, gamma, beta)


def pallas_ffn(x, wi, bi, wo, bo, gamma, beta, eps,
               tm=TM_DEFAULT, ti=TN_DEFAULT):
    M, H = x.shape
    I = wi.shape[1]
    tm, ti = _pick_tile(M, tm), _pick_tile(I, ti)
    ni = I // ti
    return pl.pallas_call(
        functools.partial(_ffn_kernel, eps=eps, n_i=ni),
        out_shape=jax.ShapeDtypeStruct((M, H), jnp.float32),
        grid=(M // tm, ni),
        in_specs=[pl.BlockSpec((tm, H), lambda i, t: (i, 0)),
                  pl.BlockSpec((H, ti), lambda i, t: (0, t)),
                  pl.BlockSpec((1, ti), lambda i, t: (0, t)),
                  pl.BlockSpec((ti, H), lambda i, t: (t, 0)),
                  pl.BlockSpec((1, H), lambda i, t: (0, 0)),
                  pl.BlockSpec((1, H), lambda i, t: (0, 0)),
                  pl.BlockSpec((1, H), lambda i, t: (0, 0))],
        out_specs=pl.BlockSpec((tm, H), lambda i, t: (i, 0)),
        scratch_shapes=[pltpu.VMEM((tm, H), jnp.float32)],
        compiler_params=pltpu.CompilerParams(
            dimension_semantics=("parallel", "arbitrary"),
            vmem_limit_bytes=VMEM_LIMIT),
    )(x, wi, bi, wo, bo, gamma, beta)


def pallas_mha(qkv, heads):
    N, L, H3 = qkv.shape
    H = H3 // 3
    dh = H // heads
    scale = 1.0 / math.sqrt(dh)
    return pl.pallas_call(
        functools.partial(_mha_kernel, heads=heads, dh=dh, scale=scale),
        out_shape=jax.ShapeDtypeStruct((N, L, H), jnp.float32),
        grid=(N,),
        in_specs=[pl.BlockSpec((1, L, H3), lambda b: (b, 0, 0))],
        out_specs=pl.BlockSpec((1, L, H), lambda b: (b, 0, 0)),
        compiler_params=pltpu.CompilerParams(
            dimension_semantics=("parallel",),   # batch sharded across v7x's 2 TCs
            vmem_limit_bytes=VMEM_LIMIT),
    )(qkv)


def pallas_word_transform(x, wt_w, wt_b, ww_w, ww_b, tm=TM_DEFAULT):
    M, D = x.shape
    H = wt_w.shape[1]
    tm = _pick_tile(M, tm)
    return pl.pallas_call(
        _word_transform_kernel,
        out_shape=jax.ShapeDtypeStruct((M, H), jnp.float32),
        grid=(M // tm,),
        in_specs=[pl.BlockSpec((tm, D), lambda i: (i, 0)),
                  pl.BlockSpec((D, H), lambda i: (0, 0)),
                  pl.BlockSpec((1, H), lambda i: (0, 0)),
                  pl.BlockSpec((H, H), lambda i: (0, 0)),
                  pl.BlockSpec((1, H), lambda i: (0, 0))],
        out_specs=pl.BlockSpec((tm, H), lambda i: (i, 0)),
        compiler_params=pltpu.CompilerParams(
            dimension_semantics=("parallel",),
            vmem_limit_bytes=VMEM_LIMIT),
    )(x, wt_w, wt_b, ww_w, ww_b)


def pallas_word_fuse(layer_out, attn_W, word_out, word_mask,
                     inter_out, inter_mask, gamma, beta, eps):
    N, L, H = layer_out.shape
    W = word_out.shape[2]
    # TODO(synk): for very long L / large W (v7x 64 MiB VMEM), add an L-tiling
    #             grid axis instead of one whole batch element per step.
    return pl.pallas_call(
        functools.partial(_word_fuse_kernel, eps=eps),
        out_shape=jax.ShapeDtypeStruct((N, L, H), jnp.float32),
        grid=(N,),
        in_specs=[
            pl.BlockSpec((1, L, H), lambda b: (b, 0, 0)),
            pl.BlockSpec((H, H), lambda b: (0, 0)),
            pl.BlockSpec((1, L, W, H), lambda b: (b, 0, 0, 0)),
            pl.BlockSpec((1, L, W), lambda b: (b, 0, 0)),
            pl.BlockSpec((1, L, W, H), lambda b: (b, 0, 0, 0)),
            pl.BlockSpec((1, L, W), lambda b: (b, 0, 0)),
            pl.BlockSpec((1, H), lambda b: (0, 0)),
            pl.BlockSpec((1, H), lambda b: (0, 0)),
        ],
        out_specs=pl.BlockSpec((1, L, H), lambda b: (b, 0, 0)),
        compiler_params=pltpu.CompilerParams(
            dimension_semantics=("parallel",),
            vmem_limit_bytes=VMEM_LIMIT),
    )(layer_out, attn_W, word_out, word_mask, inter_out, inter_mask, gamma, beta)


# ----------------------------------------------------------------------------
# Parameter init (deterministic, synthetic)
# ----------------------------------------------------------------------------
def _dense_params(key, d_in, d_out, std):
    w = jax.random.normal(key, (d_in, d_out), jnp.float32) * std
    b = jnp.zeros((1, d_out), jnp.float32)
    return w, b


def init_layer_params(key, cfg, has_word_attn):
    H, I, D = cfg["hidden_size"], cfg["intermediate_size"], cfg["word_embed_dim"]
    std = cfg["initializer_range"]
    keys = jax.random.split(key, 16)
    p = {}
    q_w, q_b = _dense_params(keys[0], H, H, std)
    k_w, k_b = _dense_params(keys[1], H, H, std)
    v_w, v_b = _dense_params(keys[2], H, H, std)
    # fused QKV projection: single [H, 3H] matmul (reads x once, 1 launch)
    p["qkv_w"] = jnp.concatenate([q_w, k_w, v_w], axis=1)
    p["qkv_b"] = jnp.concatenate([q_b, k_b, v_b], axis=1)
    p["ao_w"], p["ao_b"] = _dense_params(keys[3], H, H, std)
    p["ao_ln_g"] = jnp.ones((1, H), jnp.float32)
    p["ao_ln_b"] = jnp.zeros((1, H), jnp.float32)
    p["i_w"], p["i_b"] = _dense_params(keys[4], H, I, std)
    p["o_w"], p["o_b"] = _dense_params(keys[5], I, H, std)
    p["o_ln_g"] = jnp.ones((1, H), jnp.float32)
    p["o_ln_b"] = jnp.zeros((1, H), jnp.float32)
    p["has_word_attn"] = has_word_attn
    if has_word_attn:
        p["wt_w"], p["wt_b"] = _dense_params(keys[6], D, H, std)
        p["ww_w"], p["ww_b"] = _dense_params(keys[7], H, H, std)
        p["attn_W"] = jax.random.normal(keys[8], (H, H), jnp.float32) * std
        p["fuse_ln_g"] = jnp.ones((1, H), jnp.float32)
        p["fuse_ln_b"] = jnp.zeros((1, H), jnp.float32)
    return p


def init_encoder_params(key, cfg):
    keys = jax.random.split(key, cfg["num_hidden_layers"])
    return [init_layer_params(keys[i], cfg, i in cfg["add_layers"])
            for i in range(cfg["num_hidden_layers"])]


# ----------------------------------------------------------------------------
# Forward pass (glue in plain JAX, compute in Pallas)
# ----------------------------------------------------------------------------
def bert_layer_forward(p, hidden, word_emb, word_mask, inter_emb, inter_mask, cfg):
    N, L, H = hidden.shape
    heads = cfg["num_attention_heads"]
    eps = cfg["layer_norm_eps"]

    x2 = hidden.reshape(N * L, H)

    # --- self-attention (attention_mask=None, head_mask=None) ---
    qkv = pallas_linear(x2, p["qkv_w"], p["qkv_b"])          # [N*L, 3H]
    ctx = pallas_mha(qkv.reshape(N, L, 3 * H), heads)        # [N, L, H], lane-dense
    ctx2 = ctx.reshape(N * L, H)

    # BertSelfOutput: dense + residual + LayerNorm fused into one kernel
    attention_output = pallas_linear_add_ln(
        ctx2, p["ao_w"], p["ao_b"], x2, p["ao_ln_g"], p["ao_ln_b"], eps)

    # Fused FFN: GELU(x@Wi+bi)@Wo + bo + residual(x) -> LayerNorm
    layer_output = pallas_ffn(attention_output, p["i_w"], p["i_b"],
                              p["o_w"], p["o_b"], p["o_ln_g"], p["o_ln_b"], eps)
    layer_output = layer_output.reshape(N, L, H)

    if p["has_word_attn"]:
        Wn, D = word_emb.shape[2], word_emb.shape[3]

        def word_project(we):                 # dropout = identity (eval)
            w2 = we.reshape(N * L * Wn, D)
            t = pallas_word_transform(w2, p["wt_w"], p["wt_b"],
                                      p["ww_w"], p["ww_b"])
            return t.reshape(N, L, Wn, H)

        word_out = word_project(word_emb)
        inter_out = word_project(inter_emb)

        layer_output = pallas_word_fuse(
            layer_output, p["attn_W"], word_out, word_mask.astype(jnp.float32),
            inter_out, inter_mask.astype(jnp.float32),
            p["fuse_ln_g"], p["fuse_ln_b"], eps)

    return layer_output


def bert_encoder_forward(params, hidden, word_emb, word_mask, inter_emb,
                         inter_mask, cfg):
    for layer_params in params:
        hidden = bert_layer_forward(layer_params, hidden, word_emb, word_mask,
                                    inter_emb, inter_mask, cfg)
    return hidden


# ----------------------------------------------------------------------------
# Main
# ----------------------------------------------------------------------------
if __name__ == "__main__":
    cfg = dict(
        num_hidden_layers=2,
        add_layers=(1,),                # layer 1 gets word (lexicon) attention
        hidden_size=32,
        num_attention_heads=4,
        intermediate_size=64,
        word_embed_dim=16,
        layer_norm_eps=1e-12,
        initializer_range=0.02,
    )
    N, L, W, D, H = 2, 8, 4, cfg["word_embed_dim"], cfg["hidden_size"]

    root = jax.random.PRNGKey(0)
    kp, kh, kw, kwm, ki, kim = jax.random.split(root, 6)

    params = init_encoder_params(kp, cfg)

    hidden_states = jax.random.normal(kh, (N, L, H), jnp.float32)
    input_word_embeddings = jax.random.normal(kw, (N, L, W, D), jnp.float32)
    input_word_mask = (jax.random.uniform(kwm, (N, L, W)) > 0.3).astype(jnp.float32)
    input_inter_embeddings = jax.random.normal(ki, (N, L, W, D), jnp.float32)
    input_inter_mask = (jax.random.uniform(kim, (N, L, W)) > 0.3).astype(jnp.float32)

    out = bert_encoder_forward(params, hidden_states, input_word_embeddings,
                               input_word_mask, input_inter_embeddings,
                               input_inter_mask, cfg)
    out = jax.block_until_ready(out)
    assert out.shape == (N, L, H)
    print("KERNEL_OK")
</pallas_src>

<mosaic_0001>
module attributes {stable_mosaic.version = 11 : i64} {
  func.func @_linear_kernel(%arg0: i32, %arg1: i32, %arg2: i32, %arg3: memref<16x32xf32, #tpu.memory_space<vmem>>, %arg4: memref<32x96xf32, #tpu.memory_space<vmem>>, %arg5: memref<1x96xf32, #tpu.memory_space<vmem>>, %arg6: memref<16x96xf32, #tpu.memory_space<vmem>>, %arg7: memref<16x96xf32, #tpu.memory_space<vmem>>) attributes {dimension_semantics = [#tpu.dimension_semantics<parallel>, #tpu.dimension_semantics<parallel>, #tpu.dimension_semantics<arbitrary>], iteration_bounds = array<i64: 1, 1, 1>, scalar_prefetch = 0 : i64, scratch_operands = 1 : i64, tpu.core_type = #tpu.core_type<tc>, window_params = [{transform_indices = @transform_0, window_bounds = array<i64: 16, 32>}, {transform_indices = @transform_1, window_bounds = array<i64: 32, 96>}, {transform_indices = @transform_2, window_bounds = array<i64: 1, 96>}, {transform_indices = @transform_3, window_bounds = array<i64: 16, 96>}]} {
    %c0_i32 = arith.constant 0 : i32
    %0 = arith.cmpi eq, %arg2, %c0_i32 : i32
    %1 = arith.extui %0 : i1 to i32
    %c0_i32_0 = arith.constant 0 : i32
    %2 = arith.cmpi ne, %1, %c0_i32_0 : i32
    scf.if %2 {
      %cst_10 = arith.constant 0.000000e+00 : f32
      %14 = vector.broadcast %cst_10 : f32 to vector<16x96xf32>
      %c0_11 = arith.constant 0 : index
      %c0_12 = arith.constant 0 : index
      %15 = vector.load %arg7[%c0_11, %c0_12] : memref<16x96xf32, #tpu.memory_space<vmem>>, vector<16x96xf32>
      tpu.vector_store %arg7[%c0_11, %c0_12], %14 {strides = array<i32>} : memref<16x96xf32, #tpu.memory_space<vmem>>, vector<16x96xf32>,
    } else {
    }
    %c0 = arith.constant 0 : index
    %c0_1 = arith.constant 0 : index
    %3 = vector.load %arg7[%c0, %c0_1] : memref<16x96xf32, #tpu.memory_space<vmem>>, vector<16x96xf32>
    %c0_2 = arith.constant 0 : index
    %c0_3 = arith.constant 0 : index
    %4 = vector.load %arg3[%c0_2, %c0_3] : memref<16x32xf32, #tpu.memory_space<vmem>>, vector<16x32xf32>
    %5 = arith.truncf %4 : vector<16x32xf32> to vector<16x32xbf16>
    %c0_4 = arith.constant 0 : index
    %c0_5 = arith.constant 0 : index
    %6 = vector.load %arg4[%c0_4, %c0_5] : memref<32x96xf32, #tpu.memory_space<vmem>>, vector<32x96xf32>
    %7 = arith.truncf %6 : vector<32x96xf32> to vector<32x96xbf16>
    %cst = arith.constant dense<0.000000e+00> : vector<16x96xf32>
    %8 = tpu.matmul %5, %7, %cst {dimension_numbers = #tpu.dot_dimension_numbers<[1], [0], [0], [1], [0, 0, 1, 1], [], []>} : vector<16x32xbf16>, vector<32x96xbf16>, vector<16x96xf32> -> vector<16x96xf32>
    %9 = arith.addf %3, %8 : vector<16x96xf32>
    %c0_6 = arith.constant 0 : index
    %c0_7 = arith.constant 0 : index
    %10 = vector.load %arg7[%c0_6, %c0_7] : memref<16x96xf32, #tpu.memory_space<vmem>>, vector<16x96xf32>
    tpu.vector_store %arg7[%c0_6, %c0_7], %9 {strides = array<i32>} : memref<16x96xf32, #tpu.memory_space<vmem>>, vector<16x96xf32>,
    %c0_i32_8 = arith.constant 0 : i32
    %11 = arith.cmpi eq, %arg2, %c0_i32_8 : i32
    %12 = arith.extui %11 : i1 to i32
    %c0_i32_9 = arith.constant 0 : i32
    %13 = arith.cmpi ne, %12, %c0_i32_9 : i32
    scf.if %13 {
      %c0_10 = arith.constant 0 : index
      %c0_11 = arith.constant 0 : index
      %14 = vector.load %arg7[%c0_10, %c0_11] : memref<16x96xf32, #tpu.memory_space<vmem>>, vector<16x96xf32>
      %c0_12 = arith.constant 0 : index
      %c0_13 = arith.constant 0 : index
      %15 = vector.load %arg5[%c0_12, %c0_13] : memref<1x96xf32, #tpu.memory_space<vmem>>, vector<1x96xf32>
      %16 = vector.broadcast %15 : vector<1x96xf32> to vector<16x96xf32>
      %17 = arith.addf %14, %16 : vector<16x96xf32>
      %c0_14 = arith.constant 0 : index
      %c0_15 = arith.constant 0 : index
      %18 = vector.load %arg6[%c0_14, %c0_15] : memref<16x96xf32, #tpu.memory_space<vmem>>, vector<16x96xf32>
      tpu.vector_store %arg6[%c0_14, %c0_15], %17 {strides = array<i32>} : memref<16x96xf32, #tpu.memory_space<vmem>>, vector<16x96xf32>,
    } else {
    }
    return
  }
  func.func @transform_0(%arg0: i32, %arg1: i32, %arg2: i32) -> (i32, i32) {
    %c0_i32 = arith.constant 0 : i32
    return %arg0, %arg2 : i32, i32
  }
  func.func @transform_1(%arg0: i32, %arg1: i32, %arg2: i32) -> (i32, i32) {
    %c0_i32 = arith.constant 0 : i32
    return %arg2, %arg1 : i32, i32
  }
  func.func @transform_2(%arg0: i32, %arg1: i32, %arg2: i32) -> (i32, i32) {
    %c0_i32 = arith.constant 0 : i32
    %c0_i32_0 = arith.constant 0 : i32
    return %c0_i32, %arg1 : i32, i32
  }
  func.func @transform_3(%arg0: i32, %arg1: i32, %arg2: i32) -> (i32, i32) {
    %c0_i32 = arith.constant 0 : i32
    return %arg0, %arg1 : i32, i32
  }
}

</mosaic_0001>

<bundles_post_ra>
// kernel: tpu_custom_call.1
= control target key start
LH: loop header
LB: loop body
LE: loop exit
PB: predicated region body
PF: predicated region fallthrough
CT: control target
= control target key end

     0   :  { %8 = vsyncpa [#allocation4], 0  ;;  %s286_s0 = inlined_call_operand.hbm [shape: f32[16,32], index: 0, kind: input, shape index: {}]   ;;  %s287_s1 = inlined_call_operand.hbm [shape: f32[32,96], index: 1, kind: input, shape index: {}]   ;;  %s288_s2 = inlined_call_operand.vmem [shape: f32[1,96], index: 2, kind: input, shape index: {}]   ;;  %s289_s3 = inlined_call_operand.hbm [shape: f32[16,96], index: 3, kind: output, shape index: {}]  }
   0x1   :  { %9 = vsyncpa [#allocation7], 0 }
   0x2   :  { %10 = vsyncpa [#allocation5], 0  ;;  %s232_s12 = smov [#allocation3]  }
   0x3   :  { %s16_s13 = sshll.u32 %s232_s12, 4  ;;  %s17_s13 = int_to_ptr.vmem [resolvable:$true] %s16_s13 }
   0x4   :  { %s174_s14 = scalar_lea.vmem %s17_s13, 256  ;;  %p179_p1 = scmp.lt.s32.totalorder %s17_s13, %s17_s13 }
   0x5   :  { %p175_p0 = scmp.ne.s32.totalorder %s17_s13, %s174_s14  ;;  %p180_p2 = scmp.lt.s32.totalorder %s174_s14, %s174_s14 }
   0x7   :  { %p181_p3 = por %p180_p2, %p179_p1 }
   0x9   :  { %p182_p4 = pnand %p181_p3, %p175_p0 }
   0xb   :  { %185 = shalt.err (!%p182_p4)
}
   0xc   :  { %s233_s15 = smov 128   ;;  %s234_s16 = smov 8  }
   0xd   :  { %22 = dma.hbm_to_vmem [thread:$0]  %s286_s0, 256, %s17_s13, [#allocation4], %s233_s15, %s233_s15, %s234_s16  }
   0xe   :  { %s235_s19 = smov [#allocation6]  }
   0xf   :  { %s28_s20 = sshll.u32 %s235_s19, 4  ;;  %s29_s20 = int_to_ptr.vmem [resolvable:$true] %s28_s20 }
  0x10   :  { %s194_s21 = scalar_lea.vmem %s29_s20, 512  ;;  %p199_p6 = scmp.lt.s32.totalorder %s29_s20, %s29_s20 }
  0x11   :  { %p195_p5 = scmp.ne.s32.totalorder %s29_s20, %s194_s21  ;;  %p200_p7 = scmp.lt.s32.totalorder %s194_s21, %s194_s21 }
  0x13   :  { %p201_p8 = por %p200_p7, %p199_p6 }
  0x15   :  { %p202_p9 = pnand %p201_p8, %p195_p5 }
  0x17   :  { %205 = shalt.err (!%p202_p9)
}
  0x18   :  { %34 = dma.hbm_to_vmem [thread:$0]  %s287_s1, 512, %s29_s20, [#allocation7], %s233_s15, %s233_s15, %s234_s16  }
  0x19   :  { %226 = dma.done.wait [#allocation4], 256  }
  0x1a   :  { %227 = vsyncadd [#allocation4], 4294967040 }
  0x1b   :  { %228 = dma.done.wait [#allocation7], 512  }
  0x1c   :  { %229 = vsyncadd [#allocation7], 4294966784  ;;  %vm48_vm0 = vcmask 785408   ;;  %v236_v0 = vmov 0.0   ;;  %vm237_vm1 = vmmov 0   ;;  %v58_v1 = vld [vmem:[#allocation6 + $0x10] sm:$0xff] }
  0x1d   :  { %49 = vst.msk [vmem:[#allocation2] sm:$0xff] %vm48_vm0, %v236_v0  ;;  %50 = vst.msk [vmem:[#allocation2 + $0x8] sm:$0xff] %vm48_vm0, %v236_v0  ;;  %151 = vmatprep.subr.bf16.mxu0 %v236_v0  ;;  %155 = vmatprep.mubr.msk.bf16.mxu0 %vm237_vm1, %v236_v0  ;;  %v59_v2 = vld [vmem:[#allocation6 + $0x18] sm:$0xff]  ;;  %v56_v3 = vld [vmem:[#allocation6] sm:$0xff]  ;;  %vm62_vm2 = vcmask 261120   ;;  %s238_s24 = smov [#allocation8]  }
  0x1e   :  { %v61_v4 = vpack.c.bf16 %v59_v2, %v58_v1  ;;  %v57_v5 = vld [vmem:[#allocation6 + $0x8] sm:$0xff]  ;;  %v53_v7 = vld [vmem:[#allocation3] sm:$0xff]  ;;  %v54_v8 = vld [vmem:[#allocation3 + $0x8] sm:$0xff]  ;;  %s133_s25 = sshll.u32 %s238_s24, 4  ;;  %s134_s25 = int_to_ptr.vmem [resolvable:$true] %s133_s25 }
  0x1f   :  { %v60_v6 = vpack.c.bf16 %v57_v5, %v56_v3  ;;  %v55_v9 = vpack.c.bf16 %v54_v8, %v53_v7  ;;  %v147_v18 = vld [vmem:[%s288_s2] ss:$0 sm:$0xff]  ;;  %s206_s26 = scalar_lea.vmem %s134_s25, 256  ;;  %p211_p11 = scmp.lt.s32.totalorder %s134_s25, %s134_s25 }
  0x20   :  { %152 = vmatpush3.bf16.msra.mxu0 %v61_v4  ;;  %p207_p10 = scmp.ne.s32.totalorder %s134_s25, %s206_s26  ;;  %p212_p12 = scmp.lt.s32.totalorder %s206_s26, %s206_s26 }
  0x21   :  { %153 = vmatprep.subr.bf16.mxu0 %v236_v0 }
  0x22   :  { %p213_p13 = por %p212_p12, %p211_p11 }
  0x24   :  { %154 = vmatpush3.bf16.msra.mxu0 %v60_v6  ;;  %v51_v10 = vld [vmem:[#allocation2] sm:$0xff]  ;;  %v52_v14 = vld [vmem:[#allocation2 + $0x8] sm:$0xff]  ;;  %p214_p0 = pnand %p213_p13, %p207_p10 }
  0x27   :  { %156 = vmatmul.mubr.msk.bf16.vlgmr.msra.gmra.mxu0 %vm62_vm2, %v55_v9 }
  0xe7   :  { %v100_v11 = vpop.f32.mrf.mxu0 }
  0xe8   :  { %v107_v12 = vadd.f32 %v100_v11, %v51_v10 }
  0xe9   :  { %v157_v13 = vpop.f32.mrf.mxu0 }
  0xea   :  { %110 = vst.msk [vmem:[#allocation2] sm:$0xff] %vm48_vm0, %v107_v12 }
  0xeb   :  { %v103_v15 = vpop.f32.mrf.mxu0 }
  0xec   :  { %v108_v16 = vadd.f32 %v103_v15, %v52_v14 }
  0xed   :  { %v158_v17 = vpop.f32.mrf.mxu0 }
  0xee   :  { %111 = vst.msk [vmem:[#allocation2 + $0x8] sm:$0xff] %vm48_vm0, %v108_v16 }
  0xf1   :  { %v115_v19 = vld [vmem:[#allocation2] sm:$0xff] }
  0xf2   :  { %v124_v20 = vadd.f32 %v147_v18, %v115_v19 }
  0xf4   :  { %126 = vst.msk [vmem:[#allocation8] sm:$0xff] %vm48_vm0, %v124_v20 }
  0xf5   :  { %v116_v21 = vld [vmem:[#allocation2 + $0x8] sm:$0xff] }
  0xf6   :  { %v125_v22 = vadd.f32 %v147_v18, %v116_v21 }
  0xf8   :  { %127 = vst.msk [vmem:[#allocation8 + $0x8] sm:$0xff] %vm48_vm0, %v125_v22 }
  0xf9   :  { %217 = shalt.err (!%p214_p0)
}
  0xfa   :  { %139 = dma.vmem_to_hbm [thread:$0]  %s134_s25, 256, %s289_s3, [#allocation5], %s233_s15, %s233_s15, %s234_s16  }
  0xfb   :  { %230 = dma.done.wait [#allocation5], 256  }
  0xfc   :  { %231 = vsyncadd [#allocation5], 4294967040 }
  0xfd   :  { %143 = vsyncpa [#allocation4], 1 }
  0xfe   :  { %144 = vsyncpa [#allocation7], 1 }
  0xff   :  { %145 = vsyncpa [#allocation5], 1 }

</bundles_post_ra>
